<compile_context>
chip_gen: v6e
topology: v6e:2x2x1
jax: 0.10.0
libtpu: 0.0.40
codegen_flags: <defaults>
</compile_context>

<pallas_src>
import math

import jax
import jax.numpy as jnp
from jax.experimental import pallas as pl
from jax.experimental.pallas import tpu as pltpu

LANE = 128
# Total double-buffered (in + out) VMEM the pipeline may use for data blocks.
# ~8 MiB fits v5e's 16 MiB default scoped VMEM with headroom and is well under
# the 32 MiB scoped default on v6e / v7x.
VMEM_PIPELINE_BUDGET = 8 * 1024 * 1024
VMEM_LIMIT_BYTES = 32 * 1024 * 1024  # explicit scoped-VMEM limit (valid on v5e/v6e/v7x)


def _round_up(n: int, m: int) -> int:
    return ((n + m - 1) // m) * m


def _round_down(n: int, m: int) -> int:
    return (n // m) * m


def _sublane_multiple(dtype) -> int:
    # 32-bit rows tile in multiples of 8; bf16 packs 16 rows per vreg; int8/fp8 pack 32.
    return max(8, 32 // dtype.itemsize)


def _padded_lanes(d: int) -> int:
    # VMEM blocks pad the minor (lane) dim to a multiple of 128.
    return _round_up(max(int(d), 1), LANE)


def _worldnorm_kernel(f0_ref, f0_mu_ref, f0_rs_ref,
                      mc_ref, mc_mu_ref, mc_rs_ref,
                      ca_ref, ca_mu_ref, ca_rs_ref,
                      f0_out_ref, mc_out_ref, ca_out_ref):
    # (x - mean) * (1/std) in f32, cast to the (promoted) output dtype.
    for x_ref, mu_ref, rs_ref, o_ref in (
        (f0_ref, f0_mu_ref, f0_rs_ref, f0_out_ref),
        (mc_ref, mc_mu_ref, mc_rs_ref, mc_out_ref),
        (ca_ref, ca_mu_ref, ca_rs_ref, ca_out_ref),
    ):
        x = x_ref[...].astype(jnp.float32)
        o_ref[...] = ((x - mu_ref[...]) * rs_ref[...]).astype(o_ref.dtype)


class WORLDNormParams:
    """Deterministically-initialized parameters matching the nn.Module shapes."""

    def __init__(self, logspc_size: int, codeap_size: int, dtype=jnp.float32):
        # Module defaults are ones/zeros; use nontrivial deterministic values
        # so broadcasting is actually exercised.
        self.f0_std = jnp.ones([1], dtype=dtype) * 1.5
        self.f0_mean = jnp.ones([1], dtype=dtype) * 0.25
        self.logspc_std = 1.0 + 0.1 * jnp.arange(logspc_size, dtype=dtype)
        self.logspc_mean = 0.01 * jnp.arange(logspc_size, dtype=dtype)
        self.codeap_std = 1.0 + 0.2 * jnp.arange(codeap_size, dtype=dtype)
        self.codeap_mean = -0.05 * jnp.arange(codeap_size, dtype=dtype)


def world_norm_forward(params: WORLDNormParams, f0, mcep, codeap):
    """Pallas implementation of WORLDNorm.forward == normalize()."""
    rows = math.prod(mcep.shape[:-1])
    d_mc = int(mcep.shape[-1])
    d_ca = int(codeap.shape[-1])
    assert f0.size == rows and math.prod(codeap.shape[:-1]) == rows

    # 2D row views (free reshapes, no data movement, no padding).
    f0_2d = f0.reshape(rows, 1)
    mc_2d = mcep.reshape(rows, d_mc)
    ca_2d = codeap.reshape(rows, d_ca)

    # f32 params; one reciprocal per feature in the wrapper (kernel multiplies).
    def prep(mean, std, d):
        mu = jnp.asarray(mean, jnp.float32).reshape(1, d)
        rs = (1.0 / jnp.asarray(std, jnp.float32)).reshape(1, d)
        return mu, rs

    f0_mu, f0_rs = prep(params.f0_mean, params.f0_std, 1)
    mc_mu, mc_rs = prep(params.logspc_mean, params.logspc_std, d_mc)
    ca_mu, ca_rs = prep(params.codeap_mean, params.codeap_std, d_ca)

    # PyTorch type promotion of (x - f32 param) / f32 param.
    out_dtypes = tuple(jnp.result_type(t.dtype, jnp.float32)
                       for t in (f0, mcep, codeap))

    # Row-tile choice: fit double-buffered in+out blocks inside the budget.
    sub = max(_sublane_multiple(t.dtype) for t in (f0, mcep, codeap))
    in_row_bytes = sum(_padded_lanes(d) * t.dtype.itemsize
                       for d, t in ((1, f0), (d_mc, mcep), (d_ca, codeap)))
    out_row_bytes = sum(_padded_lanes(d) * od.itemsize
                        for d, od in ((1, out_dtypes[0]),
                                      (d_mc, out_dtypes[1]),
                                      (d_ca, out_dtypes[2])))
    pipelined_row_bytes = 2 * (in_row_bytes + out_row_bytes)  # double buffered
    tile = _round_down(VMEM_PIPELINE_BUDGET // pipelined_row_bytes, sub)
    tile = max(tile, sub)
    tile = min(tile, max(sub, _round_down(rows, sub)))  # never much larger than data

    grid = (pl.cdiv(rows, tile),)

    def data_spec(d):
        return pl.BlockSpec((tile, d), lambda i: (i, 0))

    def param_spec(d):
        return pl.BlockSpec((1, d), lambda i: (0, 0))

    total_elems = rows * (1 + d_mc + d_ca)
    out_bytes = rows * (out_dtypes[0].itemsize
                        + d_mc * out_dtypes[1].itemsize
                        + d_ca * out_dtypes[2].itemsize)
    param_bytes = sum(p.size * 4 for p in (f0_mu, f0_rs, mc_mu, mc_rs, ca_mu, ca_rs))
    cost = pl.CostEstimate(
        flops=2 * total_elems,
        transcendentals=0,
        bytes_accessed=f0_2d.nbytes + mc_2d.nbytes + ca_2d.nbytes + param_bytes + out_bytes,
    )

    # TODO(synk): on v7x, validate pltpu.CORE_PARALLEL on the row axis so both
    # TensorCores stream half the rows; "parallel" is the portable choice here.
    f0_o, mc_o, ca_o = pl.pallas_call(
        _worldnorm_kernel,
        out_shape=(
            jax.ShapeDtypeStruct((rows, 1), out_dtypes[0]),
            jax.ShapeDtypeStruct((rows, d_mc), out_dtypes[1]),
            jax.ShapeDtypeStruct((rows, d_ca), out_dtypes[2]),
        ),
        grid=grid,
        in_specs=[
            data_spec(1), param_spec(1), param_spec(1),
            data_spec(d_mc), param_spec(d_mc), param_spec(d_mc),
            data_spec(d_ca), param_spec(d_ca), param_spec(d_ca),
        ],
        out_specs=(data_spec(1), data_spec(d_mc), data_spec(d_ca)),
        compiler_params=pltpu.CompilerParams(
            dimension_semantics=("parallel",),
            vmem_limit_bytes=VMEM_LIMIT_BYTES,
        ),
        cost_estimate=cost,
    )(f0_2d, f0_mu, f0_rs, mc_2d, mc_mu, mc_rs, ca_2d, ca_mu, ca_rs)

    return (f0_o.reshape(f0.shape),
            mc_o.reshape(mcep.shape),
            ca_o.reshape(codeap.shape))


def world_norm_ref(params: WORLDNormParams, f0, mcep, codeap):
    """Pure-JAX reference mirroring the PyTorch module exactly."""
    f0_o = (f0 - params.f0_mean) / params.f0_std
    mcep_o = (mcep - params.logspc_mean) / params.logspc_std
    codeap_o = (codeap - params.codeap_mean) / params.codeap_std
    return f0_o, mcep_o, codeap_o


if __name__ == "__main__":
    logspc_size, codeap_size = 32, 4
    params = WORLDNormParams(logspc_size, codeap_size)
    fwd = jax.jit(lambda a, b, c: world_norm_forward(params, a, b, c))

    key = jax.random.PRNGKey(0)
    k1, k2, k3 = jax.random.split(key, 3)

    # Case 1: exact row tiling (B*T = 16).
    B, T = 2, 8
    f0 = jax.random.normal(k1, (B, T), dtype=jnp.float32) * 50.0 + 100.0
    mcep = jax.random.normal(k2, (B, T, logspc_size), dtype=jnp.float32)
    codeap = jax.random.normal(k3, (B, T, codeap_size), dtype=jnp.float32)

    outs = fwd(f0, mcep, codeap)
    jax.block_until_ready(outs)
    refs = world_norm_ref(params, f0, mcep, codeap)
    for o, r, x in zip(outs, refs, (f0, mcep, codeap)):
        assert o.shape == x.shape
        assert o.dtype == jnp.result_type(x.dtype, jnp.float32)
        assert jnp.allclose(o, r, atol=1e-5, rtol=1e-5)

    # Case 2: ragged row count (rows = 21, not a multiple of the tile) to
    # exercise the no-padding / masked-last-block path.
    B2, T2 = 3, 7
    f0b = jax.random.normal(k1, (B2, T2), dtype=jnp.float32) * 30.0 + 80.0
    mcepb = jax.random.normal(k2, (B2, T2, logspc_size), dtype=jnp.float32)
    codeapb = jax.random.normal(k3, (B2, T2, codeap_size), dtype=jnp.float32)

    outs_b = fwd(f0b, mcepb, codeapb)
    jax.block_until_ready(outs_b)
    refs_b = world_norm_ref(params, f0b, mcepb, codeapb)
    for o, r, x in zip(outs_b, refs_b, (f0b, mcepb, codeapb)):
        assert o.shape == x.shape
        assert jnp.allclose(o, r, atol=1e-5, rtol=1e-5)

    print("KERNEL_OK")
</pallas_src>

<mosaic_0001>
module attributes {stable_mosaic.version = 11 : i64} {
  func.func @_worldnorm_kernel(%arg0: i32, %arg1: memref<16x1xf32, #tpu.memory_space<vmem>>, %arg2: memref<1x1xf32, #tpu.memory_space<vmem>>, %arg3: memref<1x1xf32, #tpu.memory_space<vmem>>, %arg4: memref<16x32xf32, #tpu.memory_space<vmem>>, %arg5: memref<1x32xf32, #tpu.memory_space<vmem>>, %arg6: memref<1x32xf32, #tpu.memory_space<vmem>>, %arg7: memref<16x4xf32, #tpu.memory_space<vmem>>, %arg8: memref<1x4xf32, #tpu.memory_space<vmem>>, %arg9: memref<1x4xf32, #tpu.memory_space<vmem>>, %arg10: memref<16x1xf32, #tpu.memory_space<vmem>>, %arg11: memref<16x32xf32, #tpu.memory_space<vmem>>, %arg12: memref<16x4xf32, #tpu.memory_space<vmem>>) attributes {dimension_semantics = [#tpu.dimension_semantics<parallel>], iteration_bounds = array<i64: 1>, scalar_prefetch = 0 : i64, scratch_operands = 0 : i64, tpu.core_type = #tpu.core_type<tc>, window_params = [{transform_indices = @transform_0, window_bounds = array<i64: 16, 1>}, {pipeline_mode = #tpu.pipeline_mode<synchronous>, transform_indices = @transform_1, window_bounds = array<i64: 1, 1>}, {pipeline_mode = #tpu.pipeline_mode<synchronous>, transform_indices = @transform_2, window_bounds = array<i64: 1, 1>}, {transform_indices = @transform_3, window_bounds = array<i64: 16, 32>}, {pipeline_mode = #tpu.pipeline_mode<synchronous>, transform_indices = @transform_4, window_bounds = array<i64: 1, 32>}, {pipeline_mode = #tpu.pipeline_mode<synchronous>, transform_indices = @transform_5, window_bounds = array<i64: 1, 32>}, {transform_indices = @transform_6, window_bounds = array<i64: 16, 4>}, {pipeline_mode = #tpu.pipeline_mode<synchronous>, transform_indices = @transform_7, window_bounds = array<i64: 1, 4>}, {pipeline_mode = #tpu.pipeline_mode<synchronous>, transform_indices = @transform_8, window_bounds = array<i64: 1, 4>}, {transform_indices = @transform_9, window_bounds = array<i64: 16, 1>}, {transform_indices = @transform_10, window_bounds = array<i64: 16, 32>}, {transform_indices = @transform_11, window_bounds = array<i64: 16, 4>}]} {
    %c0 = arith.constant 0 : index
    %c0_0 = arith.constant 0 : index
    %0 = vector.load %arg1[%c0, %c0_0] : memref<16x1xf32, #tpu.memory_space<vmem>>, vector<16x1xf32>
    %c0_1 = arith.constant 0 : index
    %c0_2 = arith.constant 0 : index
    %1 = vector.load %arg2[%c0_1, %c0_2] : memref<1x1xf32, #tpu.memory_space<vmem>>, vector<1x1xf32>
    %2 = vector.broadcast %1 : vector<1x1xf32> to vector<16x1xf32>
    %3 = arith.subf %0, %2 : vector<16x1xf32>
    %c0_3 = arith.constant 0 : index
    %c0_4 = arith.constant 0 : index
    %4 = vector.load %arg3[%c0_3, %c0_4] : memref<1x1xf32, #tpu.memory_space<vmem>>, vector<1x1xf32>
    %5 = vector.broadcast %4 : vector<1x1xf32> to vector<16x1xf32>
    %6 = arith.mulf %3, %5 : vector<16x1xf32>
    %c0_5 = arith.constant 0 : index
    %c0_6 = arith.constant 0 : index
    %7 = vector.load %arg10[%c0_5, %c0_6] : memref<16x1xf32, #tpu.memory_space<vmem>>, vector<16x1xf32>
    tpu.vector_store %arg10[%c0_5, %c0_6], %6 {strides = array<i32>} : memref<16x1xf32, #tpu.memory_space<vmem>>, vector<16x1xf32>,
    %c0_7 = arith.constant 0 : index
    %c0_8 = arith.constant 0 : index
    %8 = vector.load %arg4[%c0_7, %c0_8] : memref<16x32xf32, #tpu.memory_space<vmem>>, vector<16x32xf32>
    %c0_9 = arith.constant 0 : index
    %c0_10 = arith.constant 0 : index
    %9 = vector.load %arg5[%c0_9, %c0_10] : memref<1x32xf32, #tpu.memory_space<vmem>>, vector<1x32xf32>
    %10 = vector.broadcast %9 : vector<1x32xf32> to vector<16x32xf32>
    %11 = arith.subf %8, %10 : vector<16x32xf32>
    %c0_11 = arith.constant 0 : index
    %c0_12 = arith.constant 0 : index
    %12 = vector.load %arg6[%c0_11, %c0_12] : memref<1x32xf32, #tpu.memory_space<vmem>>, vector<1x32xf32>
    %13 = vector.broadcast %12 : vector<1x32xf32> to vector<16x32xf32>
    %14 = arith.mulf %11, %13 : vector<16x32xf32>
    %c0_13 = arith.constant 0 : index
    %c0_14 = arith.constant 0 : index
    %15 = vector.load %arg11[%c0_13, %c0_14] : memref<16x32xf32, #tpu.memory_space<vmem>>, vector<16x32xf32>
    tpu.vector_store %arg11[%c0_13, %c0_14], %14 {strides = array<i32>} : memref<16x32xf32, #tpu.memory_space<vmem>>, vector<16x32xf32>,
    %c0_15 = arith.constant 0 : index
    %c0_16 = arith.constant 0 : index
    %16 = vector.load %arg7[%c0_15, %c0_16] : memref<16x4xf32, #tpu.memory_space<vmem>>, vector<16x4xf32>
    %c0_17 = arith.constant 0 : index
    %c0_18 = arith.constant 0 : index
    %17 = vector.load %arg8[%c0_17, %c0_18] : memref<1x4xf32, #tpu.memory_space<vmem>>, vector<1x4xf32>
    %18 = vector.broadcast %17 : vector<1x4xf32> to vector<16x4xf32>
    %19 = arith.subf %16, %18 : vector<16x4xf32>
    %c0_19 = arith.constant 0 : index
    %c0_20 = arith.constant 0 : index
    %20 = vector.load %arg9[%c0_19, %c0_20] : memref<1x4xf32, #tpu.memory_space<vmem>>, vector<1x4xf32>
    %21 = vector.broadcast %20 : vector<1x4xf32> to vector<16x4xf32>
    %22 = arith.mulf %19, %21 : vector<16x4xf32>
    %c0_21 = arith.constant 0 : index
    %c0_22 = arith.constant 0 : index
    %23 = vector.load %arg12[%c0_21, %c0_22] : memref<16x4xf32, #tpu.memory_space<vmem>>, vector<16x4xf32>
    tpu.vector_store %arg12[%c0_21, %c0_22], %22 {strides = array<i32>} : memref<16x4xf32, #tpu.memory_space<vmem>>, vector<16x4xf32>,
    return
  }
  func.func @transform_0(%arg0: i32) -> (i32, i32) {
    %c0_i32 = arith.constant 0 : i32
    %c0_i32_0 = arith.constant 0 : i32
    return %arg0, %c0_i32 : i32, i32
  }
  func.func @transform_1(%arg0: i32) -> (i32, i32) {
    %c0_i32 = arith.constant 0 : i32
    %c0_i32_0 = arith.constant 0 : i32
    %c0_i32_1 = arith.constant 0 : i32
    return %c0_i32, %c0_i32_0 : i32, i32
  }
  func.func @transform_2(%arg0: i32) -> (i32, i32) {
    %c0_i32 = arith.constant 0 : i32
    %c0_i32_0 = arith.constant 0 : i32
    %c0_i32_1 = arith.constant 0 : i32
    return %c0_i32, %c0_i32_0 : i32, i32
  }
  func.func @transform_3(%arg0: i32) -> (i32, i32) {
    %c0_i32 = arith.constant 0 : i32
    %c0_i32_0 = arith.constant 0 : i32
    return %arg0, %c0_i32 : i32, i32
  }
  func.func @transform_4(%arg0: i32) -> (i32, i32) {
    %c0_i32 = arith.constant 0 : i32
    %c0_i32_0 = arith.constant 0 : i32
    %c0_i32_1 = arith.constant 0 : i32
    return %c0_i32, %c0_i32_0 : i32, i32
  }
  func.func @transform_5(%arg0: i32) -> (i32, i32) {
    %c0_i32 = arith.constant 0 : i32
    %c0_i32_0 = arith.constant 0 : i32
    %c0_i32_1 = arith.constant 0 : i32
    return %c0_i32, %c0_i32_0 : i32, i32
  }
  func.func @transform_6(%arg0: i32) -> (i32, i32) {
    %c0_i32 = arith.constant 0 : i32
    %c0_i32_0 = arith.constant 0 : i32
    return %arg0, %c0_i32 : i32, i32
  }
  func.func @transform_7(%arg0: i32) -> (i32, i32) {
    %c0_i32 = arith.constant 0 : i32
    %c0_i32_0 = arith.constant 0 : i32
    %c0_i32_1 = arith.constant 0 : i32
    return %c0_i32, %c0_i32_0 : i32, i32
  }
  func.func @transform_8(%arg0: i32) -> (i32, i32) {
    %c0_i32 = arith.constant 0 : i32
    %c0_i32_0 = arith.constant 0 : i32
    %c0_i32_1 = arith.constant 0 : i32
    return %c0_i32, %c0_i32_0 : i32, i32
  }
  func.func @transform_9(%arg0: i32) -> (i32, i32) {
    %c0_i32 = arith.constant 0 : i32
    %c0_i32_0 = arith.constant 0 : i32
    return %arg0, %c0_i32 : i32, i32
  }
  func.func @transform_10(%arg0: i32) -> (i32, i32) {
    %c0_i32 = arith.constant 0 : i32
    %c0_i32_0 = arith.constant 0 : i32
    return %arg0, %c0_i32 : i32, i32
  }
  func.func @transform_11(%arg0: i32) -> (i32, i32) {
    %c0_i32 = arith.constant 0 : i32
    %c0_i32_0 = arith.constant 0 : i32
    return %arg0, %c0_i32 : i32, i32
  }
}

</mosaic_0001>

<bundles_post_ra>
// kernel: _lambda_.1
= control target key start
LH: loop header
LB: loop body
LE: loop exit
PB: predicated region body
PF: predicated region fallthrough
CT: control target
= control target key end

     0   :  { %s284_s0 = inlined_call_operand.vmem [shape: f32[16,1], index: 0, kind: input, shape index: {}]   ;;  %s285_s1 = inlined_call_operand.<no memory space> [shape: f32[1,1], index: 1, kind: input, shape index: {}]   ;;  %s286_s3 = inlined_call_operand.vmem [shape: f32[16,32], index: 3, kind: input, shape index: {}]   ;;  %s287_s4 = inlined_call_operand.vmem [shape: f32[1,32], index: 4, kind: input, shape index: {}]   ;;  %s288_s5 = inlined_call_operand.vmem [shape: f32[1,32], index: 5, kind: input, shape index: {}]   ;;  %s289_s6 = inlined_call_operand.vmem [shape: f32[16,4], index: 6, kind: input, shape index: {}]   ;;  %s290_s7 = inlined_call_operand.vmem [shape: f32[1,4], index: 7, kind: input, shape index: {}]   ;;  %s291_s8 = inlined_call_operand.vmem [shape: f32[1,4], index: 8, kind: input, shape index: {}]   ;;  %s292_s9 = inlined_call_operand.vmem [shape: f32[16,1], index: 9, kind: output, shape index: {0}]   ;;  %s293_s10 = inlined_call_operand.hbm [shape: f32[16,32], index: 10, kind: output, shape index: {1}]   ;;  %s294_s11 = inlined_call_operand.vmem [shape: f32[16,4], index: 11, kind: output, shape index: {2}]   ;;  %s295_s2 = inlined_call_operand.<no memory space> [shape: f32[1,1], index: 2, kind: input, shape index: {}]  }
   0x1   :  { %v17_v0 = vstv %s285_s1  ;;  %v19_v1 = vstv %s295_s2 }
   0x2   :  { %18 = vst [vmem:[#allocation2] sm:$0x1] %v17_v0  ;;  %20 = vst [vmem:[#allocation3] sm:$0x1] %v19_v1 }
   0x3   :  { %v63_v2 = vld [vmem:[%s286_s3] sm:$0xff]  ;;  %vm83_vm0 = vcmask 261120   ;;  %v64_v6 = vld [vmem:[%s286_s3 + $0x8] sm:$0xff]  ;;  %vm60_vm1 = vcmask 7168   ;;  %s164_s17 = smov [#allocation4]  }
   0x4   :  { %v135_v3 = vld [vmem:[%s287_s4] ss:$0 sm:$0xff]  ;;  %v41_v12 = vld [vmem:[%s284_s0 + $0x8] sm:$0xff] }
   0x5   :  { %v136_v4 = vld [vmem:[%s288_s5] ss:$0 sm:$0xff]  ;;  %v72_v5 = vsub.f32 %v63_v2, %v135_v3  ;;  %v73_v9 = vsub.f32 %v64_v6, %v135_v3  ;;  %v87_v18 = vld [vmem:[%s289_s6 + $0x8] sm:$0xff] }
   0x6   :  { %v40_v7 = vld [vmem:[%s284_s0] sm:$0xff]  ;;  %s116_s0 = sshll.u32 %s164_s17, 4  ;;  %s117_s0 = int_to_ptr.vmem [resolvable:$true] %s116_s0 }
   0x7   :  { %v86_v13 = vld [vmem:[%s289_s6] sm:$0xff]  ;;  %v81_v14 = vmul.f32 %v136_v4, %v72_v5  ;;  %v82_v19 = vmul.f32 %v136_v4, %v73_v9 }
   0x8   :  { %v137_v16 = vld [vmem:[%s290_s7] ss:$0 sm:$0xff] }
   0x9   :  { %v133_v8 = vld [vmem:[#allocation2] ss:$0 sm:$0xff]  ;;  %v134_v11 = vld [vmem:[#allocation3] ss:$0 sm:$0xff]  ;;  %v95_v21 = vsub.f32 %v86_v13, %v137_v16  ;;  %v96_v22 = vsub.f32 %v87_v18, %v137_v16 }
   0xa   :  { %v49_v10 = vsub.f32 %v40_v7, %v133_v8  ;;  %v50_v15 = vsub.f32 %v41_v12, %v133_v8  ;;  %v138_v17 = vld [vmem:[%s291_s8] ss:$0 sm:$0xff] }
   0xc   :  { %v58_v20 = vmul.f32 %v134_v11, %v49_v10 }
   0xd   :  { %21 = vsyncpa [#allocation5], 0  ;;  %84 = vst.msk [vmem:[#allocation4] sm:$0xff] %vm83_vm0, %v81_v14  ;;  %v59_v23 = vmul.f32 %v134_v11, %v50_v15  ;;  %vm106_vm2 = vcmask 31744   ;;  %v104_v24 = vmul.f32 %v138_v17, %v95_v21  ;;  %v105_v25 = vmul.f32 %v138_v17, %v96_v22  ;;  %s142_s19 = scalar_lea.vmem %s117_s0, 256  ;;  %p147_p1 = scmp.lt.s32.totalorder %s117_s0, %s117_s0 }
   0xe   :  { %85 = vst.msk [vmem:[#allocation4 + $0x8] sm:$0xff] %vm83_vm0, %v82_v19  ;;  %p143_p0 = scmp.ne.s32.totalorder %s117_s0, %s142_s19  ;;  %p148_p2 = scmp.lt.s32.totalorder %s142_s19, %s142_s19 }
   0xf   :  { %61 = vst.msk [vmem:[%s292_s9] sm:$0xff] %vm60_vm1, %v58_v20  ;;  %62 = vst.msk [vmem:[%s292_s9 + $0x8] sm:$0xff] %vm60_vm1, %v59_v23 }
  0x10   :  { %p149_p3 = por %p148_p2, %p147_p1 }
  0x12   :  { %p150_p4 = pnand %p149_p3, %p143_p0 }
  0x14   :  { %153 = shalt.err (!%p150_p4)
}
  0x15   :  { %s165_s20 = smov 128   ;;  %s166_s21 = smov 8   ;;  %107 = vst.msk [vmem:[%s294_s11] sm:$0xff] %vm106_vm2, %v104_v24  ;;  %108 = vst.msk [vmem:[%s294_s11 + $0x8] sm:$0xff] %vm106_vm2, %v105_v25 }
  0x16   :  { %122 = dma.vmem_to_hbm [thread:$0]  %s117_s0, 256, %s293_s10, [#allocation5], %s165_s20, %s165_s20, %s166_s21  }
  0x17   :  { %162 = dma.done.wait [#allocation5], 256  }
  0x18   :  { %163 = vsyncadd [#allocation5], 4294967040 }
  0x19   :  { %132 = vsyncpa [#allocation5], 1 }

</bundles_post_ra>
